<compile_context>
chip_gen: v6e
topology: v6e:2x2x1
jax: 0.10.0
libtpu: 0.0.40
codegen_flags: <defaults>
</compile_context>

<pallas_src>
import functools
import math
import numpy as np
import jax
import jax.numpy as jnp
from jax.experimental import pallas as pl
from jax.experimental.pallas import tpu as pltpu


def _round_up(x: int, m: int) -> int:
    return ((x + m - 1) // m) * m


# ----------------------------- parameter setup (host, cached) ----------------------

def get_mel_filters_np(n_mels: int, n_fft: int, sample_rate: float) -> np.ndarray:
    """Numpy port of the PyTorch get_mel_filters (Slaney-style mel scale)."""
    f_max = sample_rate / 2
    if f_max < 1000:
        mel_max = f_max * 3 / 200
    else:
        mel_max = 15 + 27 * math.log(f_max / 1000, 6.4)
    mel_freqs = np.linspace(0.0, mel_max, n_mels + 2)
    mel_freqs = np.where(mel_freqs < 15, mel_freqs * 200 / 3,
                         1000 * 6.4 ** ((mel_freqs - 15) / 27))
    fft_freqs = np.linspace(0.0, sample_rate / 2, n_fft // 2 + 1)
    mel_diff = np.diff(mel_freqs)
    ramp = mel_freqs[:, None] - fft_freqs[None, :]
    lower = -ramp[:-2] / mel_diff[:-1, None]
    upper = ramp[2:] / mel_diff[1:, None]
    filters = np.clip(np.minimum(lower, upper), 0.0, None)
    filters = filters * (2.0 / (mel_freqs[2:, None] - mel_freqs[:-2, None]))
    return filters.astype(np.float32)                       # (n_mels, n_freq)


@functools.lru_cache(maxsize=None)
def _mel_constants(n_fft: int, n_mels: int, sample_rate: float):
    """Window-folded [cos;sin] DFT matrix (transposed) + padded mel filterbank.

    Built once per (n_fft, n_mels, sample_rate) with numpy (float64 angles),
    returned as device arrays in bfloat16.
    """
    n = np.arange(n_fft, dtype=np.float64)
    window = 0.5 - 0.5 * np.cos(2.0 * np.pi * n / n_fft)       # hann (periodic)
    n_freq = n_fft // 2 + 1
    Fp = _round_up(n_freq, 128)                                 # sublane/lane aligned
    f = np.arange(n_freq, dtype=np.float64)
    ang = 2.0 * np.pi * np.outer(n, f) / n_fft
    cos_t = (np.cos(ang) * window[:, None]).T                   # (n_freq, n_fft)
    sin_t = (np.sin(ang) * window[:, None]).T                   # sign irrelevant for power
    dft_t = np.zeros((2 * Fp, n_fft), np.float32)
    dft_t[:n_freq, :] = cos_t
    dft_t[Fp:Fp + n_freq, :] = sin_t                            # rows: [w*cos ; w*sin]

    n_mels_pad = _round_up(n_mels, 128)
    filt = get_mel_filters_np(n_mels, n_fft, sample_rate)       # (n_mels, n_freq)
    filt_p = np.zeros((n_mels_pad, Fp), np.float32)
    filt_p[:n_mels, :n_freq] = filt

    return (jnp.asarray(dft_t, dtype=jnp.bfloat16),
            jnp.asarray(filt_p, dtype=jnp.bfloat16),
            Fp, n_mels_pad)


def _vmem_budget_bytes() -> int:
    """~75% of physical VMEM (v7x: ~48 MiB, v5e/v6e: ~96 MiB); conservative fallback."""
    try:
        info = pltpu.get_tpu_info()
        cap = getattr(info, "vmem_capacity_bytes", None)
        if cap:
            return int(0.75 * int(cap))
    except Exception:
        pass
    return 48 * (1 << 20)


def _const_spec(shape):
    """BlockSpec for a grid-invariant operand; single-buffered when supported."""
    idx = lambda b, i: (0, 0)
    if hasattr(pl, "Buffered"):
        try:
            return pl.BlockSpec(shape, idx, pipeline_mode=pl.Buffered(1))
        except TypeError:
            pass
    return pl.BlockSpec(shape, idx)


# ----------------------------- Pallas kernel (hot path) ---------------------------

def mel_kernel(frames_ref, dft_ref, filt_ref, out_ref, *, n_freq_pad: int):
    # frames_ref: (n_fft, tile)       bf16  — windowing already folded into dft
    # dft_ref:    (2*Fp, n_fft)       bf16  — rows [w*cos ; w*sin], each half Fp rows
    # filt_ref:   (n_mels_pad, Fp)    bf16  — mel filterbank (zero-padded)
    # out_ref:    (n_mels_pad, tile)  f32   — lane-dense, already transposed output
    y = jnp.dot(dft_ref[...], frames_ref[...],
                preferred_element_type=jnp.float32)             # (2Fp, tile) re|im
    re = y[:n_freq_pad, :]                                      # sublane-aligned slices
    im = y[n_freq_pad:, :]
    power = re * re + im * im                                   # |X|^2 (VPU, f32)
    out_ref[...] = jnp.dot(filt_ref[...], power.astype(jnp.bfloat16),
                           preferred_element_type=jnp.float32)  # mel projection


def mel_spectrogram(x, n_fft, hop_length, n_mels, sample_rate, tile_frames=512):
    B, T = x.shape
    pad = n_fft // 2
    n_frames = 1 + T // hop_length

    dft_t, filt_p, Fp, n_mels_pad = _mel_constants(int(n_fft), int(n_mels),
                                                   float(sample_rate))

    # Frame tile: always a multiple of 128 (lane-dense loads/stores, fills the MXU).
    tile_frames = max(128, _round_up(int(tile_frames), 128))
    tile = min(tile_frames, _round_up(n_frames, 128))
    n_frames_pad = _round_up(n_frames, tile)
    # Guarantee >=2 grid steps when possible so v7x's two TensorCores both get work.
    if B * (n_frames_pad // tile) < 2 and tile > 128:
        tile = max(128, _round_up((n_frames + 1) // 2, 128))
        n_frames_pad = _round_up(n_frames, tile)
    grid = (B, n_frames_pad // tile)

    # --- torch.stft(center=True, pad_mode='reflect') framing (glue, transposed) ---
    x_pad = jnp.pad(x, ((0, 0), (pad, pad)), mode="reflect")
    idx = jnp.arange(n_fft)[:, None] + jnp.arange(n_frames)[None, :] * hop_length
    frames = x_pad[:, idx]                                      # (B, n_fft, n_frames)
    frames = jnp.pad(frames, ((0, 0), (0, 0), (0, n_frames_pad - n_frames)))
    frames = frames.astype(jnp.bfloat16)
    # TODO(synk): in-kernel framing (pl.ANY audio + per-tile chunk DMA) would avoid
    # this gather's ~n_fft/hop HBM traffic expansion for mem-bound configs.

    # Advisory cost estimate: two matmuls dominate.
    flops = (2 * B * n_frames_pad * n_fft * (2 * Fp)
             + 2 * B * n_frames_pad * Fp * n_mels_pad)
    bytes_accessed = (B * n_fft * n_frames_pad * 2 + 2 * Fp * n_fft * 2
                      + n_mels_pad * Fp * 2 + B * n_mels_pad * n_frames_pad * 4)

    # Per-step VMEM working set (frames/out double-buffered, constants single-buffered,
    # plus f32/bf16 intermediates).
    working_set = (2 * n_fft * tile * 2
                   + 2 * Fp * n_fft * 2
                   + n_mels_pad * Fp * 2
                   + 2 * n_mels_pad * tile * 4
                   + 3 * Fp * tile * 4 + Fp * tile * 2)
    cp_kwargs = dict(dimension_semantics=("parallel", "parallel"))
    if working_set > 12 * (1 << 20):
        cp_kwargs["vmem_limit_bytes"] = int(min(max(2 * working_set, 16 << 20),
                                                _vmem_budget_bytes()))

    out = pl.pallas_call(
        functools.partial(mel_kernel, n_freq_pad=Fp),
        out_shape=jax.ShapeDtypeStruct((B, n_mels_pad, n_frames_pad), jnp.float32),
        grid=grid,
        in_specs=[
            pl.BlockSpec((None, n_fft, tile), lambda b, i: (b, 0, i)),
            _const_spec((2 * Fp, n_fft)),
            _const_spec((n_mels_pad, Fp)),
        ],
        out_specs=pl.BlockSpec((None, n_mels_pad, tile), lambda b, i: (b, 0, i)),
        compiler_params=pltpu.CompilerParams(**cp_kwargs),
        cost_estimate=pl.CostEstimate(flops=flops, transcendentals=0,
                                      bytes_accessed=bytes_accessed),
    )(frames, dft_t, filt_p)

    # Output already in the PyTorch convention (B, n_mels, n_frames); just slice.
    return out[:, :n_mels, :n_frames]


# ----------------------------------- main ------------------------------------------

if __name__ == "__main__":
    key = jax.random.PRNGKey(0)
    B, T = 2, 256
    n_fft, hop_length, n_mels, sample_rate = 64, 16, 16, 16000

    x = jax.random.normal(key, (B, T), dtype=jnp.float32)

    out = mel_spectrogram(x, n_fft, hop_length, n_mels, sample_rate)
    out = jax.block_until_ready(out)

    # pure-JAX reference (jnp.fft) mirroring torch semantics
    pad = n_fft // 2
    x_pad = jnp.pad(x, ((0, 0), (pad, pad)), mode="reflect")
    n_frames = 1 + T // hop_length
    idx = jnp.arange(n_frames)[:, None] * hop_length + jnp.arange(n_fft)[None, :]
    frames = x_pad[:, idx]                                        # (B, n_frames, n_fft)
    n = jnp.arange(n_fft, dtype=jnp.float32)
    win = 0.5 - 0.5 * jnp.cos(2.0 * jnp.pi * n / n_fft)
    spec = jnp.fft.rfft(frames * win, axis=-1)
    power = jnp.abs(spec) ** 2                                    # (B, n_frames, n_freq)
    filters = jnp.asarray(get_mel_filters_np(n_mels, n_fft, sample_rate))
    ref = jnp.einsum("mf,bnf->bmn", filters, power)               # (B, n_mels, n_frames)

    assert out.shape == (B, n_mels, n_frames), out.shape
    np.testing.assert_allclose(np.asarray(out), np.asarray(ref), rtol=3e-2, atol=3e-2)
    print("KERNEL_OK")
</pallas_src>

<mosaic_0001>
module attributes {stable_mosaic.version = 11 : i64} {
  func.func @mel_kernel(%arg0: i32, %arg1: i32, %arg2: memref<1x64x128xbf16, #tpu.memory_space<vmem>>, %arg3: memref<256x64xbf16, #tpu.memory_space<vmem>>, %arg4: memref<128x128xbf16, #tpu.memory_space<vmem>>, %arg5: memref<1x128x128xf32, #tpu.memory_space<vmem>>) attributes {dimension_semantics = [#tpu.dimension_semantics<parallel>, #tpu.dimension_semantics<parallel>], iteration_bounds = array<i64: 2, 1>, scalar_prefetch = 0 : i64, scratch_operands = 0 : i64, tpu.core_type = #tpu.core_type<tc>, window_params = [{transform_indices = @transform_0, window_bounds = array<i64: 1, 64, 128>}, {pipeline_mode = #tpu.pipeline_mode<synchronous>, transform_indices = @transform_1, window_bounds = array<i64: 256, 64>}, {pipeline_mode = #tpu.pipeline_mode<synchronous>, transform_indices = @transform_2, window_bounds = array<i64: 128, 128>}, {transform_indices = @transform_3, window_bounds = array<i64: 1, 128, 128>}]} {
    %c0 = arith.constant 0 : index
    %c0_0 = arith.constant 0 : index
    %0 = vector.load %arg3[%c0, %c0_0] : memref<256x64xbf16, #tpu.memory_space<vmem>>, vector<256x64xbf16>
    %c0_1 = arith.constant 0 : index
    %c0_2 = arith.constant 0 : index
    %c0_3 = arith.constant 0 : index
    %1 = vector.load %arg2[%c0_1, %c0_2, %c0_3] : memref<1x64x128xbf16, #tpu.memory_space<vmem>>, vector<1x64x128xbf16>
    %2 = vector.shape_cast %1 : vector<1x64x128xbf16> to vector<64x128xbf16>
    %cst = arith.constant dense<0.000000e+00> : vector<256x128xf32>
    %3 = tpu.matmul %0, %2, %cst {dimension_numbers = #tpu.dot_dimension_numbers<[1], [0], [0], [1], [0, 0, 1, 1], [], []>} : vector<256x64xbf16>, vector<64x128xbf16>, vector<256x128xf32> -> vector<256x128xf32>
    %4 = vector.extract_strided_slice %3 {offsets = [0, 0], sizes = [128, 128], strides = [1, 1]} : vector<256x128xf32> to vector<128x128xf32>
    %5 = vector.extract_strided_slice %3 {offsets = [128, 0], sizes = [128, 128], strides = [1, 1]} : vector<256x128xf32> to vector<128x128xf32>
    %6 = arith.mulf %4, %4 : vector<128x128xf32>
    %7 = arith.mulf %5, %5 : vector<128x128xf32>
    %8 = arith.addf %6, %7 : vector<128x128xf32>
    %c0_4 = arith.constant 0 : index
    %c0_5 = arith.constant 0 : index
    %9 = vector.load %arg4[%c0_4, %c0_5] : memref<128x128xbf16, #tpu.memory_space<vmem>>, vector<128x128xbf16>
    %10 = arith.truncf %8 : vector<128x128xf32> to vector<128x128xbf16>
    %cst_6 = arith.constant dense<0.000000e+00> : vector<128x128xf32>
    %11 = tpu.matmul %9, %10, %cst_6 {dimension_numbers = #tpu.dot_dimension_numbers<[1], [0], [0], [1], [0, 0, 1, 1], [], []>} : vector<128x128xbf16>, vector<128x128xbf16>, vector<128x128xf32> -> vector<128x128xf32>
    %c0_7 = arith.constant 0 : index
    %c0_8 = arith.constant 0 : index
    %c0_9 = arith.constant 0 : index
    %12 = vector.load %arg5[%c0_7, %c0_8, %c0_9] : memref<1x128x128xf32, #tpu.memory_space<vmem>>, vector<1x128x128xf32>
    %13 = vector.shape_cast %12 : vector<1x128x128xf32> to vector<128x128xf32>
    %14 = vector.shape_cast %11 : vector<128x128xf32> to vector<1x128x128xf32>
    tpu.vector_store %arg5[%c0_7, %c0_8, %c0_9], %14 {strides = array<i32>} : memref<1x128x128xf32, #tpu.memory_space<vmem>>, vector<1x128x128xf32>,
    return
  }
  func.func @transform_0(%arg0: i32, %arg1: i32) -> (i32, i32, i32) {
    %c0_i32 = arith.constant 0 : i32
    %c0_i32_0 = arith.constant 0 : i32
    return %arg0, %c0_i32, %arg1 : i32, i32, i32
  }
  func.func @transform_1(%arg0: i32, %arg1: i32) -> (i32, i32) {
    %c0_i32 = arith.constant 0 : i32
    %c0_i32_0 = arith.constant 0 : i32
    %c0_i32_1 = arith.constant 0 : i32
    return %c0_i32, %c0_i32_0 : i32, i32
  }
  func.func @transform_2(%arg0: i32, %arg1: i32) -> (i32, i32) {
    %c0_i32 = arith.constant 0 : i32
    %c0_i32_0 = arith.constant 0 : i32
    %c0_i32_1 = arith.constant 0 : i32
    return %c0_i32, %c0_i32_0 : i32, i32
  }
  func.func @transform_3(%arg0: i32, %arg1: i32) -> (i32, i32, i32) {
    %c0_i32 = arith.constant 0 : i32
    %c0_i32_0 = arith.constant 0 : i32
    return %arg0, %c0_i32, %arg1 : i32, i32, i32
  }
}

</mosaic_0001>

<bundles_post_ra>
// kernel: tpu_custom_call.1
= control target key start
LH: loop header
LB: loop body
LE: loop exit
PB: predicated region body
PF: predicated region fallthrough
CT: control target
= control target key end

     0   :  { %8 = vsyncpa [#allocation3], 0  ;;  %s1477_s0 = inlined_call_operand.vmem [shape: bf16[2,64,128], index: 0, kind: input, shape index: {}]   ;;  %s1478_s1 = inlined_call_operand.vmem [shape: bf16[256,64], index: 1, kind: input, shape index: {}]   ;;  %s1479_s2 = inlined_call_operand.vmem [shape: bf16[128,128], index: 2, kind: input, shape index: {}]   ;;  %s1480_s3 = inlined_call_operand.hbm [shape: f32[2,128,128], index: 3, kind: output, shape index: {}]  }
   0x1   :  { %10 = vsyncpa [#allocation3 + $0x1], 0  ;;  %s1228_s12 = smov 0   ;;  %s1230_s13 = smov 0  }
   0x2   :  { %s1232_s14 = smov 0   ;;  %s1234_s15 = smov 0  }
   0x3   :  { %s1236_s16 = smov 0   ;;  %s1238_s17 = smov 0  }
   0x4 LB: > { %s875_s18 = sadd.s32 4294967295, %s1203_s17   ;;  %s876_s19 = sadd.s32 4294967294, %s1203_s17   ;;  %s1203_s17 = sphi %s1238_s17, %s16_s17   ;;  %s1199_s16 = sphi %s1236_s16, %s1487_s16   ;;  %s1195_s15 = sphi %s1234_s15, %s1486_s15   ;;  %s1191_s14 = sphi %s1232_s14, %s1485_s14   ;;  %s1187_s13 = sphi %s1230_s13, %s1484_s13   ;;  %s1183_s12 = sphi %s1228_s12, %s1483_s12  }
   0x5   : > { %s28_s20 = sadd.s32 1, %s1199_s16  ;;  %s107_s21 = sadd.s32 1, %s1191_s14 }
   0x6   : > { %p30_p0 = scmp.ge.s32.totalorder %s28_s20, 2  ;;  %p117_p1 = scmp.ne.s32.totalorder %s1191_s14, %s1187_s13 }
   0x7   : > { %p118_p2 = scmp.eq.s32.totalorder %s875_s18, 1  ;;  %p123_p3 = scmp.ne.s32.totalorder %s1187_s13, %s1183_s12 }
   0x8   : > { %s1489_s20 = smov (%p30_p0, %s28_s20), 0  ;;  %p124_p5 = scmp.eq.s32.totalorder %s876_s19, 1 }
   0x9   : > { %p1268_p4 = por %p118_p2, %p117_p1  ;;  %s102_s23 = ssub.s32 %s1199_s16, %s1489_s20 }
   0xa   : > { %p879_p6 = scmp.ge.s32.totalorder %s1203_s17, 1  ;;  %p105_p7 = scmp.eq.s32.totalorder %s102_s23, 0 }
   0xb   : > { %p1275_p8 = por %p124_p5, %p123_p3  ;;  %p159_p9 = scmp.lt.s32.totalorder %s1203_s17, 3 }
   0xc   : > { %s1281_s25 = scalar_select %p105_p7, %s1191_s14, %s107_s21  }
   0xd   : > { %p160_p10 = pnand %p879_p6, %p159_p9 }
   0xe   : > { %p186_p11 = scmp.lt.s32.totalorder (!%p160_p10), %s1195_s15, 1  ;;  %s933_s4 = sshll.u32 (!%p160_p10), %s1195_s15, 11 }
   0xf   : > { %163 = sbr.rel (%p160_p10) target bundleno = 569 (0x239), region = 32  ;;  %s1424_s8 = scalar_lea.hbm (!%p160_p10), %s1480_s3, %s933_s4 }
  0x10   : > { %s1205_s10 = smov (!%p160_p10), [#allocation2]  }
  0x11   : > { %s1131_s11 = sshll.u32 (!%p160_p10), %s1205_s10, 4  ;;  %s1132_s11 = int_to_ptr.vmem [resolvable:$false] %s1131_s11 }
  0x12   : > { %s1133_s18 = scalar_lea.vmem (!%p160_p10), %s1132_s11, 4096 }
  0x14   : > { %v1103_v0 = vld [vmem:[%s1478_s1] sm:$0xff]   ;;  %vm339_vm0 = vcmask 523264   ;;  %s187_s28 = scalar_select %p186_p11, %s1195_s15, 1  ;;  %v1104_v5 = vld [vmem:[%s1478_s1 + $0x8] sm:$0xff]   ;;  %v1105_v6 = vld [vmem:[%s1478_s1 + $0x10] sm:$0xff]  }
  0x15   : > { %978 = vmatprep.mubr.msk.bf16.mxu0 %vm339_vm0, %v1103_v0  ;;  %v1106_v7 = vld [vmem:[%s1478_s1 + $0x18] sm:$0xff]   ;;  %v1107_v8 = vld [vmem:[%s1478_s1 + $0x20] sm:$0xff]   ;;  %v1108_v9 = vld [vmem:[%s1478_s1 + $0x28] sm:$0xff]  }
  0x16   : > { %s932_s29 = sshll.u32 %s187_s28, 5  ;;  %v1109_v10 = vld [vmem:[%s1478_s1 + $0x30] sm:$0xff]   ;;  %v1110_v11 = vld [vmem:[%s1478_s1 + $0x38] sm:$0xff]   ;;  %v1111_v12 = vld [vmem:[%s1478_s1 + $0x40] sm:$0xff]   ;;  %s183_s28 = sand.u32 1, %s1187_s13  }
  0x17   : > { %s193_s5 = scalar_lea.vmem %s1477_s0, %s932_s29  ;;  %v1112_v13 = vld [vmem:[%s1478_s1 + $0x48] sm:$0xff]   ;;  %v1113_v14 = vld [vmem:[%s1478_s1 + $0x50] sm:$0xff]   ;;  %v1114_v15 = vld [vmem:[%s1478_s1 + $0x58] sm:$0xff]   ;;  %s880_s29 = sshll.u32 %s183_s28, 7 }
  0x18   : > { %v1099_v1 = vld [vmem:[%s193_s5 + $0x18] sm:$0xff]   ;;  %v1100_v2 = vld [vmem:[%s193_s5 + $0x10] sm:$0xff]   ;;  %v1101_v3 = vld [vmem:[%s193_s5 + $0x8] sm:$0xff]   ;;  %s1403_s30 = scalar_lea.vmem [#allocation2], %s880_s29  ;;  %s1432_s9 = scalar_lea.sflag [#allocation3], %s183_s28 }
  0x19   : > { %970 = vmatprep.subr.bf16.mxu0 %v1099_v1  ;;  %v1102_v4 = vld [vmem:[%s193_s5] sm:$0xff]   ;;  %v1116_v17 = vld [vmem:[%s1478_s1 + $0x68] sm:$0xff]   ;;  %v1117_v18 = vld [vmem:[%s1478_s1 + $0x70] sm:$0xff]   ;;  %s797_s5 = sshll.u32 %s1403_s30, 4  ;;  %s1426_s5 = int_to_ptr.vmem [resolvable:$true] %s797_s5 }
  0x1a   : > { %971 = vmatpush3.bf16.msra.mxu0 %v1099_v1  ;;  %v1115_v16 = vld [vmem:[%s1478_s1 + $0x60] sm:$0xff]   ;;  %v1118_v19 = vld [vmem:[%s1478_s1 + $0x78] sm:$0xff]   ;;  %s1127_s15 = scalar_lea.vmem %s1426_s5, 2048  ;;  %p1134_p1 = scmp.lt.s32.totalorder %s1426_s5, %s1132_s11 }
  0x1b   : > { %972 = vmatprep.subr.bf16.mxu0 %v1100_v2  ;;  %v1119_v20 = vld [vmem:[%s1479_s2] sm:$0xff]   ;;  %p1128_p12 = scmp.ne.s32.totalorder %s1426_s5, %s1127_s15  ;;  %p1135_p2 = scmp.lt.s32.totalorder %s1133_s18, %s1127_s15 }
  0x1c   : > { %1026 = vmatprep.mubr.bf16.mxu1 %v1119_v20 }
  0x1d   : > { %p1129_p13 = pnand %p1128_p12, %p1268_p4  ;;  %p1136_p3 = por %p1135_p2, %p1134_p1 }
  0x1e   : > { %973 = vmatpush3.bf16.msra.mxu0 %v1100_v2 }
  0x1f   : > { %974 = vmatprep.subr.bf16.mxu0 %v1101_v3  ;;  %p1130_p0 = pneg %p1129_p13 }
  0x21   : > { %p1137_p5 = pnand %p1136_p3, %p1130_p0 }
  0x22   : > { %975 = vmatpush3.bf16.msra.mxu0 %v1101_v3 }
  0x23   : > { %976 = vmatprep.subr.bf16.mxu0 %v1102_v4 }
  0x26   : > { %977 = vmatpush3.bf16.msra.mxu0 %v1102_v4 }
  0x29   : > { %979 = vmatmul.mubr.msk.bf16.vlgmr.msra.gmra.mxu0 %vm339_vm0, %v1104_v5 }
  0x2a   : > { %982 = vmatprep.mubr.msk.bf16.mxu0 %vm339_vm0, %v1105_v6 }
  0x31   : > { %983 = vmatmul.mubr.msk.bf16.gmra.mxu0 %vm339_vm0, %v1106_v7 }
  0x32   : > { %986 = vmatprep.mubr.msk.bf16.mxu0 %vm339_vm0, %v1107_v8 }
  0x39   : > { %987 = vmatmul.mubr.msk.bf16.gmra.mxu0 %vm339_vm0, %v1108_v9 }
  0x3a   : > { %990 = vmatprep.mubr.msk.bf16.mxu0 %vm339_vm0, %v1109_v10 }
  0x41   : > { %991 = vmatmul.mubr.msk.bf16.gmra.mxu0 %vm339_vm0, %v1110_v11 }
  0x42   : > { %994 = vmatprep.mubr.msk.bf16.mxu0 %vm339_vm0, %v1111_v12 }
  0x49   : > { %995 = vmatmul.mubr.msk.bf16.gmra.mxu0 %vm339_vm0, %v1112_v13 }
  0x4a   : > { %998 = vmatprep.mubr.msk.bf16.mxu0 %vm339_vm0, %v1113_v14 }
  0x51   : > { %999 = vmatmul.mubr.msk.bf16.gmra.mxu0 %vm339_vm0, %v1114_v15 }
  0x52   : > { %1002 = vmatprep.mubr.msk.bf16.mxu0 %vm339_vm0, %v1115_v16 }
  0x59   : > { %1003 = vmatmul.mubr.msk.bf16.gmra.mxu0 %vm339_vm0, %v1116_v17 }
  0x5a   : > { %1006 = vmatprep.mubr.msk.bf16.mxu0 %vm339_vm0, %v1117_v18 }
  0x61   : > { %1007 = vmatmul.mubr.msk.bf16.gmra.mxu0 %vm339_vm0, %v1118_v19 }
  0xe9   : > { %v980_v21 = vpop.f32.mrf.mxu0 }
  0xea   : > { %v551_v41 = vmul.f32 %v980_v21, %v980_v21 }
  0xeb   : > { %v422_v22 = vpop.f32.mrf.mxu0 }
  0xec   : > { %v549_v45 = vmul.f32 %v422_v22, %v422_v22 }
  0xed   : > { %v981_v23 = vpop.f32.mrf.mxu0 }
  0xee   : > { %v552_v42 = vmul.f32 %v981_v23, %v981_v23 }
  0xef   : > { %v425_v24 = vpop.f32.mrf.mxu0 }
  0xf0   : > { %v550_v47 = vmul.f32 %v425_v24, %v425_v24 }
  0xf1   : > { %v1355_v25 = vpop.f32.mrf.mxu0 }
  0xf3   : > { %v438_v26 = vpop.f32.mrf.mxu0 }
  0xf4   : > { %v553_v60 = vmul.f32 %v438_v26, %v438_v26 }
  0xf5   : > { %v1357_v27 = vpop.f32.mrf.mxu0 }
  0xf7   : > { %v441_v28 = vpop.f32.mrf.mxu0 }
  0xf8   : > { %v554_v61 = vmul.f32 %v441_v28, %v441_v28 }
  0xf9   : > { %v988_v29 = vpop.f32.mrf.mxu0 }
  0xfa   : > { %v559_v28 = vmul.f32 %v988_v29, %v988_v29  ;;  %v556_v29 = vmul.f32 %v1357_v27, %v1357_v27  ;;  %v1121_v27 = vld [vmem:[%s1479_s2 + $0x10] sm:$0xff]  }
  0xfb   : > { %v1359_v30 = vpop.f32.mrf.mxu0 }
  0xfd   : > { %v989_v31 = vpop.f32.mrf.mxu0 }
  0xfe   : > { %v560_v21 = vmul.f32 %v989_v31, %v989_v31 }
  0xff   : > { %v1361_v32 = vpop.f32.mrf.mxu0 }
 0x101   : > { %v992_v33 = vpop.f32.mrf.mxu0 }
 0x102   : > { %v563_v10 = vmul.f32 %v992_v33, %v992_v33  ;;  %v558_v33 = vmul.f32 %v1361_v32, %v1361_v32 }
 0x103   : > { %v470_v34 = vpop.f32.mrf.mxu0 }
 0x104   : > { %v561_v14 = vmul.f32 %v470_v34, %v470_v34 }
 0x105   : > { %v993_v35 = vpop.f32.mrf.mxu0 }
 0x106   : > { %v564_v11 = vmul.f32 %v993_v35, %v993_v35 }
 0x107   : > { %v473_v36 = vpop.f32.mrf.mxu0 }
 0x108   : > { %v562_v15 = vmul.f32 %v473_v36, %v473_v36  ;;  %v557_v36 = vmul.f32 %v1359_v30, %v1359_v30  ;;  %v1122_v30 = vld [vmem:[%s1479_s2 + $0x18] sm:$0xff]  }
 0x109   : > { %v996_v37 = vpop.f32.mrf.mxu0 }
 0x10a   : > { %v567_v39 = vmul.f32 %v996_v37, %v996_v37 }
 0x10b   : > { %v486_v38 = vpop.f32.mrf.mxu0 }
 0x10c   : > { %v565_v43 = vmul.f32 %v486_v38, %v486_v38  ;;  %v583_v48 = vadd.f32 %v567_v39, %v551_v41 }
 0x10d   : > { %v997_v40 = vpop.f32.mrf.mxu0 }
 0x10e   : > { %v568_v44 = vmul.f32 %v997_v40, %v997_v40  ;;  %v581_v52 = vadd.f32 %v565_v43, %v549_v45 }
 0x10f   : > { %v489_v46 = vpop.f32.mrf.mxu0 }
 0x110   : > { %v584_v49 = vadd.f32 %v568_v44, %v552_v42  ;;  %v566_v50 = vmul.f32 %v489_v46, %v489_v46  ;;  %v555_v44 = vmul.f32 %v1355_v25, %v1355_v25  ;;  %v1120_v25 = vld [vmem:[%s1479_s2 + $0x8] sm:$0xff]  }
 0x111   : > { %v1000_v51 = vpop.f32.mrf.mxu0 }
 0x112   : > { %v582_v53 = vadd.f32 %v566_v50, %v550_v47  ;;  %v1363_v54 = vpack.c.bf16 %v584_v49, %v583_v48  ;;  %v571_v42 = vmul.f32 %v1000_v51, %v1000_v51  ;;  %v1123_v48 = vld [vmem:[%s1479_s2 + $0x20] sm:$0xff]   ;;  %v1124_v49 = vld [vmem:[%s1479_s2 + $0x28] sm:$0xff]   ;;  %v1125_v50 = vld [vmem:[%s1479_s2 + $0x30] sm:$0xff]  }
 0x113   : > { %v502_v55 = vpop.f32.mrf.mxu0  ;;  %v1126_v51 = vld [vmem:[%s1479_s2 + $0x38] sm:$0xff]  }
 0x114   : > { %v1365_v56 = vpack.c.bf16 %v582_v53, %v581_v52  ;;  %v569_v58 = vmul.f32 %v502_v55, %v502_v55  ;;  %v587_v46 = vadd.f32 %v571_v42, %v555_v44 }
 0x115   : > { %v1001_v57 = vpop.f32.mrf.mxu0 }
 0x116   : > { %v585_v0 = vadd.f32 %v569_v58, %v553_v60  ;;  %v572_v31 = vmul.f32 %v1001_v57, %v1001_v57 }
 0x117   : > { %v505_v59 = vpop.f32.mrf.mxu0 }
 0x118   : > { %v570_v62 = vmul.f32 %v505_v59, %v505_v59  ;;  %v588_v32 = vadd.f32 %v572_v31, %v556_v29 }
 0x119   : > { %v1004_v63 = vpop.f32.mrf.mxu0 }
 0x11a   : > { %v586_v1 = vadd.f32 %v570_v62, %v554_v61  ;;  %v575_v22 = vmul.f32 %v1004_v63, %v1004_v63  ;;  %v616_v47 = vpack.c.bf16 %v588_v32, %v587_v46 }
 0x11b   : > { %v518_v2 = vpop.f32.mrf.mxu0 }
 0x11c   : > { %v615_v3 = vpack.c.bf16 %v586_v1, %v585_v0  ;;  %v591_v34 = vadd.f32 %v575_v22, %v559_v28  ;;  %v573_v35 = vmul.f32 %v518_v2, %v518_v2 }
 0x11d   : > { %v1005_v4 = vpop.f32.mrf.mxu0 }
 0x11e   : > { %v576_v17 = vmul.f32 %v1005_v4, %v1005_v4  ;;  %v589_v43 = vadd.f32 %v573_v35, %v557_v36 }
 0x11f   : > { %v521_v5 = vpop.f32.mrf.mxu0 }
 0x120   : > { %v592_v37 = vadd.f32 %v576_v17, %v560_v21  ;;  %v574_v38 = vmul.f32 %v521_v5, %v521_v5 }
 0x121   : > { %v1008_v6 = vpop.f32.mrf.mxu0 }
 0x122   : > { %v579_v8 = vmul.f32 %v1008_v6, %v1008_v6  ;;  %v590_v40 = vadd.f32 %v574_v38, %v558_v33  ;;  %v618_v41 = vpack.c.bf16 %v592_v37, %v591_v34 }
 0x123   : > { %v534_v7 = vpop.f32.mrf.mxu0 }
 0x124   : > { %v577_v12 = vmul.f32 %v534_v7, %v534_v7  ;;  %v595_v18 = vadd.f32 %v579_v8, %v563_v10  ;;  %v617_v45 = vpack.c.bf16 %v590_v40, %v589_v43 }
 0x125   : > { %v1009_v9 = vpop.f32.mrf.mxu0 }
 0x126   : > { %v580_v13 = vmul.f32 %v1009_v9, %v1009_v9  ;;  %v593_v23 = vadd.f32 %v577_v12, %v561_v14 }
 0x127   : > { %v537_v16 = vpop.f32.mrf.mxu0 }
 0x128   : > { %v596_v19 = vadd.f32 %v580_v13, %v564_v11  ;;  %v578_v20 = vmul.f32 %v537_v16, %v537_v16 }
 0x12a   : > { %v594_v24 = vadd.f32 %v578_v20, %v562_v15  ;;  %v620_v26 = vpack.c.bf16 %v596_v19, %v595_v18 }
 0x12c   : > { %v619_v39 = vpack.c.bf16 %v594_v24, %v593_v23  ;;  %1010 = vmatprep.subr.bf16.mxu1 %v620_v26 }
 0x12d   : > { %1011 = vmatpush3.bf16.msra.mxu1 %v620_v26 }
 0x12e   : > { %1012 = vmatprep.subr.bf16.mxu1 %v619_v39 }
 0x131   : > { %1013 = vmatpush3.bf16.msra.mxu1 %v619_v39 }
 0x132   : > { %1014 = vmatprep.subr.bf16.mxu1 %v618_v41 }
 0x135   : > { %1015 = vmatpush3.bf16.msra.mxu1 %v618_v41 }
 0x136   : > { %1016 = vmatprep.subr.bf16.mxu1 %v617_v45 }
 0x139   : > { %1017 = vmatpush3.bf16.msra.mxu1 %v617_v45 }
 0x13a   : > { %1018 = vmatprep.subr.bf16.mxu1 %v616_v47 }
 0x13d   : > { %1019 = vmatpush3.bf16.msra.mxu1 %v616_v47 }
 0x13e   : > { %1020 = vmatprep.subr.bf16.mxu1 %v615_v3 }
 0x141   : > { %1021 = vmatpush3.bf16.msra.mxu1 %v615_v3 }
 0x142   : > { %1022 = vmatprep.subr.bf16.mxu1 %v1363_v54 }
 0x145   : > { %1023 = vmatpush3.bf16.msra.mxu1 %v1363_v54 }
 0x146   : > { %1024 = vmatprep.subr.bf16.mxu1 %v1365_v56 }
 0x149   : > { %1025 = vmatpush3.bf16.msra.mxu1 %v1365_v56 }
 0x14c   : > { %1027 = vmatmul.mubr.bf16.vlgmr.msra.gmra.mxu1 %v1120_v25 }
 0x14d   : > { %1030 = vmatprep.mubr.bf16.mxu1 %v1121_v27 }
 0x154   : > { %1031 = vmatmul.mubr.bf16.gmra.mxu1 %v1122_v30 }
 0x155   : > { %1034 = vmatprep.mubr.bf16.mxu1 %v1123_v48 }
 0x15c   : > { %1035 = vmatmul.mubr.bf16.gmra.mxu1 %v1124_v49 }
 0x15d   : > { %1038 = vmatprep.mubr.bf16.mxu1 %v1125_v50 }
 0x164   : > { %1039 = vmatmul.mubr.bf16.gmra.mxu1 %v1126_v51 }
 0x20c   : > { %v1028_v52 = vpop.f32.mrf.mxu1 }
 0x20d   : > { %768 = vst [vmem:[%s1403_s30 + $0x10] sm:$0xff] %v1028_v52 }
 0x20e   : > { %v703_v53 = vpop.f32.mrf.mxu1 }
 0x20f   : > { %766 = vst [vmem:[%s1403_s30] sm:$0xff] %v703_v53 }
 0x210   : > { %v1029_v54 = vpop.f32.mrf.mxu1 }
 0x211   : > { %769 = vst [vmem:[%s1403_s30 + $0x18] sm:$0xff] %v1029_v54 }
 0x212   : > { %v706_v55 = vpop.f32.mrf.mxu1 }
 0x213   : > { %767 = vst [vmem:[%s1403_s30 + $0x8] sm:$0xff] %v706_v55 }
 0x214   : > { %v1032_v56 = vpop.f32.mrf.mxu1 }
 0x215   : > { %772 = vst [vmem:[%s1403_s30 + $0x30] sm:$0xff] %v1032_v56 }
 0x216   : > { %v719_v57 = vpop.f32.mrf.mxu1 }
 0x217   : > { %770 = vst [vmem:[%s1403_s30 + $0x20] sm:$0xff] %v719_v57 }
 0x218   : > { %v1033_v58 = vpop.f32.mrf.mxu1 }
 0x219   : > { %773 = vst [vmem:[%s1403_s30 + $0x38] sm:$0xff] %v1033_v58 }
 0x21a   : > { %v722_v59 = vpop.f32.mrf.mxu1 }
 0x21b   : > { %771 = vst [vmem:[%s1403_s30 + $0x28] sm:$0xff] %v722_v59 }
 0x21c   : > { %v1036_v60 = vpop.f32.mrf.mxu1 }
 0x21d   : > { %776 = vst [vmem:[%s1403_s30 + $0x50] sm:$0xff] %v1036_v60 }
 0x21e   : > { %v735_v61 = vpop.f32.mrf.mxu1 }
 0x21f   : > { %774 = vst [vmem:[%s1403_s30 + $0x40] sm:$0xff] %v735_v61 }
 0x220   : > { %v1037_v62 = vpop.f32.mrf.mxu1 }
 0x221   : > { %777 = vst [vmem:[%s1403_s30 + $0x58] sm:$0xff] %v1037_v62 }
 0x222   : > { %v738_v63 = vpop.f32.mrf.mxu1 }
 0x223   : > { %775 = vst [vmem:[%s1403_s30 + $0x48] sm:$0xff] %v738_v63 }
 0x224   : > { %v1040_v0 = vpop.f32.mrf.mxu1 }
 0x225   : > { %780 = vst [vmem:[%s1403_s30 + $0x70] sm:$0xff] %v1040_v0 }
 0x226   : > { %v751_v1 = vpop.f32.mrf.mxu1 }
 0x227   : > { %778 = vst [vmem:[%s1403_s30 + $0x60] sm:$0xff] %v751_v1 }
 0x228   : > { %v1041_v2 = vpop.f32.mrf.mxu1 }
 0x229   : > { %781 = vst [vmem:[%s1403_s30 + $0x78] sm:$0xff] %v1041_v2 }
 0x22a   : > { %v754_v3 = vpop.f32.mrf.mxu1 }
 0x22b   : > { %779 = vst [vmem:[%s1403_s30 + $0x68] sm:$0xff] %v754_v3 }
 0x22c   : > { %1140 = shalt.err (!%p1137_p5)
}
 0x22d   : > { %s1141_s19 = scalar_lea.hbm %s1424_s8, 2048  ;;  %s1145_s26 = scalar_lea.hbm %s1480_s3, 4096 }
 0x22e   : > { %p1142_p6 = scmp.ne.s32.totalorder %s1424_s8, %s1141_s19  ;;  %p1146_p10 = scmp.lt.s32.totalorder %s1424_s8, %s1480_s3 }
 0x22f   : > { %p1147_p11 = scmp.lt.s32.totalorder %s1145_s26, %s1141_s19 }
 0x230   : > { %p1143_p7 = pnand %p1142_p6, %p1268_p4 }
 0x231   : > { %p1148_p12 = por %p1147_p11, %p1146_p10 }
 0x232   : > { %p1144_p9 = pneg %p1143_p7 }
 0x234   : > { %p1149_p13 = pnand %p1148_p12, %p1144_p9 }
 0x236   : > { %1152 = shalt.err (!%p1149_p13)
}
 0x237   : > { %s1206_s29 = smov 128   ;;  %s1207_s30 = smov 8  }
 0x238   : > { %1042 = dma.vmem_to_hbm [thread:$0]  (%p1268_p4), %s1426_s5, 2048, %s1424_s8, %s1432_s9, %s1206_s29, %s1206_s29, %s1207_s30  }
 0x239 PF: > { %p1048_p0 = scmp.ge.s32.totalorder %s1203_s17, 2  ;;  %s812_s4 = sand.u32 1, %s1183_s12  }
 0x23a   : > { %s813_s6 = scalar_lea.sflag [#allocation3], %s812_s4 }
 0x23b   : > { %p1045_p1 = pnand %p1048_p0, %p1275_p8 }
 0x23d   : > { %p1046_p2 = pneg %p1045_p1 }
 0x23f   : > { %1178 = dma.done.wait (%p1046_p2), %s813_s6, 2048  }
 0x240   : > { %1180 = vsyncadd (%p1046_p2), %s813_s6, 4294965248  ;;  %s16_s17 = sadd.s32 1, %s1203_s17   ;;  %s1483_s12 = smov %s1187_s13 }
 0x241   : > { %p13_p3 = scmp.ge.s32.totalorder %s16_s17, 4   ;;  %s1484_s13 = smov %s1191_s14 }
 0x242   : > { %s1485_s14 = smov %s1281_s25  ;;  %s1486_s15 = smov %s1199_s16 }
 0x243   : > { %s1487_s16 = smov %s1489_s20  ;;  %15 = sbr.rel (!%p13_p3) target bundleno = 4 (0x4), region = 67 }
 0x248   :  { %818 = vsyncpa [#allocation3], 1 }
 0x249   :  { %820 = vsyncpa [#allocation3 + $0x1], 1 }

</bundles_post_ra>
